<compile_context>
chip_gen: v7x
topology: tpu7x:2x2x1
jax: 0.10.0
libtpu: 0.0.40
codegen_flags: <defaults>
</compile_context>

<pallas_src>
import functools

import jax
import jax.numpy as jnp
from jax.experimental import pallas as pl
from jax.experimental.pallas import tpu as pltpu


_LANE = 128     # lane width (last dim)
_SUBLANE = 8    # f32 sublane group (second-to-last dim)

_SUPPORTED_ACTS = ("relu", "sigmoid", "leaky_relu", "none")


def _round_up(n, m):
    return ((n + m - 1) // m) * m


def _apply_act(y, act):
    if act == "relu":
        return jnp.maximum(y, 0.0)
    if act == "sigmoid":
        # EUP exp; approx reciprocal also issues on the EUP slot.
        return pl.reciprocal(1.0 + jnp.exp(-y), approx=True)
    if act == "leaky_relu":
        return jnp.where(y >= 0.0, y, 0.1 * y)
    if act == "none":
        return y
    raise NotImplementedError(f"activation {act} not supported")


def _make_fused_mlp_kernel(activations):
    """Kernel body: x -> (Linear + act) * n_layers, fully resident in VMEM."""
    n_layers = len(activations)

    def kernel(*refs):
        # refs = (x_ref, w0, b0, w1, b1, ..., o_ref)
        x_ref = refs[0]
        o_ref = refs[-1]
        wb = refs[1:-1]
        assert len(wb) == 2 * n_layers

        y = x_ref[...]
        for i, act in enumerate(activations):
            w = wb[2 * i][...]        # [in_pad, out_pad]
            b = wb[2 * i + 1][...]    # [1, out_pad] broadcasts over rows
            y = jnp.dot(y, w, preferred_element_type=jnp.float32) + b
            y = _apply_act(y, act)
        o_ref[...] = y.astype(o_ref.dtype)

    return kernel


@functools.partial(jax.jit, static_argnames=("activations", "out_dim"))
def _fused_mlp(x, weights, biases, activations, out_dim):
    """One fused pallas_call for the entire MLP. Returns [B, out_dim]."""
    B, D = x.shape
    in_pad = weights[0].shape[0]
    out_pad = weights[-1].shape[1]
    B_pad = _round_up(max(B, 1), _SUBLANE)

    # Zero-pad input to the lane-dense, sublane-aligned staging shape.
    x_p = jnp.pad(x.astype(jnp.float32), ((0, B_pad - B), (0, in_pad - D)))

    operands = [x_p]
    for w, b in zip(weights, biases):
        operands.append(w)
        operands.append(b)

    vmem = pltpu.MemorySpace.VMEM
    y_p = pl.pallas_call(
        _make_fused_mlp_kernel(activations),
        out_shape=jax.ShapeDtypeStruct((B_pad, out_pad), jnp.float32),
        in_specs=[pl.BlockSpec(memory_space=vmem)] * len(operands),
        out_specs=pl.BlockSpec(memory_space=vmem),
        # Total resident footprint here is a few hundred KiB; state the limit
        # explicitly so widening the layers later fails loudly instead of
        # silently overflowing v7x's smaller VMEM.
        compiler_params=pltpu.CompilerParams(vmem_limit_bytes=32 * 1024 * 1024),
    )(*operands)

    # Single slice back to the logical shape.
    return y_p[:B, :out_dim]


class ACLPallas:
    """JAX/Pallas re-implementation of the PyTorch ACL module."""

    def __init__(self, queryvectordim, layers, activations, contextvectordim, key):
        layers = list(layers) + [contextvectordim]
        assert len(layers) == len(activations), (
            "number of activations must match number of layers "
            "(output layer also needs an activation, usually 'none')"
        )
        for a in activations:
            if a not in _SUPPORTED_ACTS:
                raise NotImplementedError(f"`activations {a}` is only suporrted")

        self.activations = tuple(activations)
        self.contextvectordim = int(contextvectordim)

        # Padded params for the kernel (lane-dense), unpadded for reference.
        self.weights = []      # [in_pad, out_pad]
        self.biases = []       # [1, out_pad]
        self._w_ref = []       # [in,  out]
        self._b_ref = []       # [out]

        p_dim = int(queryvectordim)
        for out_dim in layers:
            out_dim = int(out_dim)
            key, wk, bk = jax.random.split(key, 3)
            # Deterministic init mimicking torch.nn.Linear default
            # (uniform in [-1/sqrt(in), 1/sqrt(in)]).
            bound = 1.0 / (p_dim ** 0.5)
            w_torch_layout = jax.random.uniform(
                wk, (out_dim, p_dim), jnp.float32, -bound, bound
            )
            b = jax.random.uniform(bk, (out_dim,), jnp.float32, -bound, bound)

            w = jnp.asarray(w_torch_layout.T)           # [in, out]
            self._w_ref.append(w)
            self._b_ref.append(b)

            in_pad = _round_up(p_dim, _LANE)
            out_pad = _round_up(out_dim, _LANE)
            w_p = jnp.zeros((in_pad, out_pad), jnp.float32).at[:p_dim, :out_dim].set(w)
            b_p = jnp.zeros((1, out_pad), jnp.float32).at[0, :out_dim].set(b)
            self.weights.append(w_p)
            self.biases.append(b_p)

            p_dim = out_dim

    def __call__(self, queryvector, yi=None):
        # `yi` is unused, exactly as in the PyTorch forward().
        return _fused_mlp(
            queryvector,
            self.weights,
            self.biases,
            self.activations,
            self.contextvectordim,
        )

    # pure-JAX reference for verification
    def reference(self, queryvector, yi=None):
        x = queryvector
        for w, b, act in zip(self._w_ref, self._b_ref, self.activations):
            x = x @ w + b[None, :]
            if act == "relu":
                x = jnp.maximum(x, 0.0)
            elif act == "sigmoid":
                x = jax.nn.sigmoid(x)
            elif act == "leaky_relu":
                x = jnp.where(x >= 0.0, x, 0.1 * x)
        return x


if __name__ == "__main__":
    key = jax.random.PRNGKey(0)

    # ---- Config 1: matches the module's typical constructor ----------------
    # ACL(queryvectordim=32, layers=[64, 48],
    #     activations=['relu','leaky_relu','none'], contextvectordim=16)
    key, k_params, k_x, k_y = jax.random.split(key, 4)
    model = ACLPallas(32, [64, 48], ["relu", "leaky_relu", "none"], 16, k_params)

    batch = 8
    queryvector = jax.random.normal(k_x, (batch, 32), jnp.float32)
    yi = jax.random.normal(k_y, (batch, 4), jnp.float32)  # unused, as in PyTorch

    out = jax.block_until_ready(model(queryvector, yi))
    ref = model.reference(queryvector, yi)
    assert out.shape == (batch, 16), out.shape
    assert jnp.allclose(out, ref, atol=1e-5, rtol=1e-5), "mismatch vs reference (cfg1)"

    # ---- Config 2: exercises the sigmoid path and a ragged batch ------------
    key, k_params2, k_x2 = jax.random.split(key, 3)
    model2 = ACLPallas(24, [40], ["sigmoid", "none"], 12, k_params2)
    batch2 = 5  # not a multiple of 8 -> exercises batch padding
    qv2 = jax.random.normal(k_x2, (batch2, 24), jnp.float32)

    out2 = jax.block_until_ready(model2(qv2))
    ref2 = model2.reference(qv2)
    assert out2.shape == (batch2, 12), out2.shape
    # Looser tolerance: sigmoid uses the EUP approx reciprocal in-kernel.
    assert jnp.allclose(out2, ref2, atol=5e-3, rtol=5e-3), "mismatch vs reference (cfg2)"

    print("KERNEL_OK")
</pallas_src>

<mosaic_0001>
module attributes {stable_mosaic.version = 11 : i64} {
  func.func @kernel(%arg0: memref<8x128xf32, #tpu.memory_space<vmem>>, %arg1: memref<128x128xf32, #tpu.memory_space<vmem>>, %arg2: memref<1x128xf32, #tpu.memory_space<vmem>>, %arg3: memref<128x128xf32, #tpu.memory_space<vmem>>, %arg4: memref<1x128xf32, #tpu.memory_space<vmem>>, %arg5: memref<128x128xf32, #tpu.memory_space<vmem>>, %arg6: memref<1x128xf32, #tpu.memory_space<vmem>>, %arg7: memref<8x128xf32, #tpu.memory_space<vmem>>) attributes {dimension_semantics = [], scalar_prefetch = 0 : i64, scratch_operands = 0 : i64, tpu.core_type = #tpu.core_type<tc>} {
    %c0 = arith.constant 0 : index
    %c0_0 = arith.constant 0 : index
    %0 = vector.load %arg0[%c0, %c0_0] : memref<8x128xf32, #tpu.memory_space<vmem>>, vector<8x128xf32>
    %c0_1 = arith.constant 0 : index
    %c0_2 = arith.constant 0 : index
    %1 = vector.load %arg1[%c0_1, %c0_2] : memref<128x128xf32, #tpu.memory_space<vmem>>, vector<128x128xf32>
    %c0_3 = arith.constant 0 : index
    %c0_4 = arith.constant 0 : index
    %2 = vector.load %arg2[%c0_3, %c0_4] : memref<1x128xf32, #tpu.memory_space<vmem>>, vector<1x128xf32>
    %cst = arith.constant dense<0.000000e+00> : vector<8x128xf32>
    %3 = tpu.matmul %0, %1, %cst {dimension_numbers = #tpu.dot_dimension_numbers<[1], [0], [0], [1], [0, 0, 1, 1], [], []>} : vector<8x128xf32>, vector<128x128xf32>, vector<8x128xf32> -> vector<8x128xf32>
    %4 = vector.broadcast %2 : vector<1x128xf32> to vector<8x128xf32>
    %5 = arith.addf %3, %4 : vector<8x128xf32>
    %cst_5 = arith.constant 0.000000e+00 : f32
    %6 = vector.broadcast %cst_5 : f32 to vector<8x128xf32>
    %7 = arith.maximumf %5, %6 : vector<8x128xf32>
    %c0_6 = arith.constant 0 : index
    %c0_7 = arith.constant 0 : index
    %8 = vector.load %arg3[%c0_6, %c0_7] : memref<128x128xf32, #tpu.memory_space<vmem>>, vector<128x128xf32>
    %c0_8 = arith.constant 0 : index
    %c0_9 = arith.constant 0 : index
    %9 = vector.load %arg4[%c0_8, %c0_9] : memref<1x128xf32, #tpu.memory_space<vmem>>, vector<1x128xf32>
    %cst_10 = arith.constant dense<0.000000e+00> : vector<8x128xf32>
    %10 = tpu.matmul %7, %8, %cst_10 {dimension_numbers = #tpu.dot_dimension_numbers<[1], [0], [0], [1], [0, 0, 1, 1], [], []>} : vector<8x128xf32>, vector<128x128xf32>, vector<8x128xf32> -> vector<8x128xf32>
    %11 = vector.broadcast %9 : vector<1x128xf32> to vector<8x128xf32>
    %12 = arith.addf %10, %11 : vector<8x128xf32>
    %cst_11 = arith.constant 0.000000e+00 : f32
    %13 = vector.broadcast %cst_11 : f32 to vector<8x128xf32>
    %14 = arith.cmpf oge, %12, %13 : vector<8x128xf32>
    %cst_12 = arith.constant 1.000000e-01 : f32
    %15 = vector.broadcast %cst_12 : f32 to vector<8x128xf32>
    %16 = arith.mulf %15, %12 : vector<8x128xf32>
    %17 = arith.select %14, %12, %16 : vector<8x128xi1>, vector<8x128xf32>
    %c0_13 = arith.constant 0 : index
    %c0_14 = arith.constant 0 : index
    %18 = vector.load %arg5[%c0_13, %c0_14] : memref<128x128xf32, #tpu.memory_space<vmem>>, vector<128x128xf32>
    %c0_15 = arith.constant 0 : index
    %c0_16 = arith.constant 0 : index
    %19 = vector.load %arg6[%c0_15, %c0_16] : memref<1x128xf32, #tpu.memory_space<vmem>>, vector<1x128xf32>
    %cst_17 = arith.constant dense<0.000000e+00> : vector<8x128xf32>
    %20 = tpu.matmul %17, %18, %cst_17 {dimension_numbers = #tpu.dot_dimension_numbers<[1], [0], [0], [1], [0, 0, 1, 1], [], []>} : vector<8x128xf32>, vector<128x128xf32>, vector<8x128xf32> -> vector<8x128xf32>
    %21 = vector.broadcast %19 : vector<1x128xf32> to vector<8x128xf32>
    %22 = arith.addf %20, %21 : vector<8x128xf32>
    %c0_18 = arith.constant 0 : index
    %c0_19 = arith.constant 0 : index
    %23 = vector.load %arg7[%c0_18, %c0_19] : memref<8x128xf32, #tpu.memory_space<vmem>>, vector<8x128xf32>
    tpu.vector_store %arg7[%c0_18, %c0_19], %22 {strides = array<i32>} : memref<8x128xf32, #tpu.memory_space<vmem>>, vector<8x128xf32>,
    return
  }
}

</mosaic_0001>

<bundles_post_ra>
// kernel: _fused_mlp.1
= control target key start
LH: loop header
LB: loop body
LE: loop exit
PB: predicated region body
PF: predicated region fallthrough
CT: control target
= control target key end

     0   :  { %12 = vsyncpa [#allocation3], 0  ;;  %s858_s0 = inlined_call_operand.vmem [shape: f32[8,128], index: 0, kind: input, shape index: {}]   ;;  %s859_s1 = inlined_call_operand.hbm [shape: f32[128,128], index: 1, kind: input, shape index: {}]   ;;  %s860_s2 = inlined_call_operand.vmem [shape: f32[1,128], index: 2, kind: input, shape index: {}]   ;;  %s861_s3 = inlined_call_operand.hbm [shape: f32[128,128], index: 3, kind: input, shape index: {}]   ;;  %s862_s4 = inlined_call_operand.vmem [shape: f32[1,128], index: 4, kind: input, shape index: {}]   ;;  %s863_s5 = inlined_call_operand.hbm [shape: f32[128,128], index: 5, kind: input, shape index: {}]   ;;  %s864_s6 = inlined_call_operand.vmem [shape: f32[1,128], index: 6, kind: input, shape index: {}]   ;;  %s865_s7 = inlined_call_operand.hbm [shape: f32[8,128], index: 7, kind: output, shape index: {}]  }
   0x1   :  { %13 = vsyncpa [#allocation6], 0 }
   0x2   :  { %14 = vsyncpa [#allocation4], 0  ;;  %s703_s24 = smov [#allocation5]   ;;  %s704_s26 = smov [#allocation2]  }
   0x3   :  { %s36_s25 = sshll.u32 %s703_s24, 4  ;;  %s22_s27 = sshll.u32 %s704_s26, 4  ;;  %s37_s25 = int_to_ptr.vmem [resolvable:$true] %s36_s25  ;;  %s752_s27 = int_to_ptr.vmem [resolvable:$true] %s22_s27 }
   0x4   :  { %s609_s30 = scalar_lea.hbm %s861_s3, 2048 }
   0x5   :  { %p610_p0 = scmp.ne.s32.totalorder %s861_s3, %s609_s30  ;;  %p613_p1 = scmp.lt.u32.totalorder %s609_s30, %s861_s3 }
   0x7   :  { %p615_p2 = pnand %p613_p1, %p610_p0 }
   0x9   :  { %618 = shalt.err (!%p615_p2)
}
   0xa   :  { %s619_s12 = scalar_lea.vmem %s37_s25, 2048  ;;  %p624_p4 = scmp.lt.s32.totalorder %s37_s25, %s37_s25 }
   0xb   :  { %p620_p3 = scmp.ne.s32.totalorder %s37_s25, %s619_s12  ;;  %p625_p5 = scmp.lt.s32.totalorder %s619_s12, %s619_s12 }
   0xd   :  { %p626_p6 = por %p625_p5, %p624_p4 }
   0xf   :  { %p627_p7 = pnand %p626_p6, %p620_p3 }
  0x11   :  { %630 = shalt.err (!%p627_p7)
}
  0x12   :  { %s705_s13 = smov 128   ;;  %s706_s14 = smov 8  }
  0x13   :  { %42 = dma.hbm_to_vmem [thread:$0]  %s861_s3, 2048, %s37_s25, [#allocation6], %s705_s13, %s705_s13, %s706_s14  }
  0x14   :  { %s631_s19 = scalar_lea.hbm %s859_s1, 2048 }
  0x15   :  { %p632_p8 = scmp.ne.s32.totalorder %s859_s1, %s631_s19  ;;  %p635_p9 = scmp.lt.u32.totalorder %s631_s19, %s859_s1 }
  0x17   :  { %p637_p10 = pnand %p635_p9, %p632_p8 }
  0x19   :  { %640 = shalt.err (!%p637_p10)
}
  0x1a   :  { %s641_s24 = scalar_lea.vmem %s752_s27, 2048  ;;  %p646_p12 = scmp.lt.s32.totalorder %s752_s27, %s752_s27 }
  0x1b   :  { %p642_p11 = scmp.ne.s32.totalorder %s752_s27, %s641_s24  ;;  %p647_p13 = scmp.lt.s32.totalorder %s641_s24, %s641_s24 }
  0x1d   :  { %p648_p0 = por %p647_p13, %p646_p12 }
  0x1f   :  { %p649_p1 = pnand %p648_p0, %p642_p11 }
  0x21   :  { %652 = shalt.err (!%p649_p1)
}
  0x22   :  { %28 = dma.hbm_to_vmem [thread:$0]  %s859_s1, 2048, %s752_s27, [#allocation3], %s705_s13, %s705_s13, %s706_s14  }
  0x23   :  { %s707_s26 = smov [#allocation7]   ;;  %s653_s8 = scalar_lea.hbm %s863_s5, 2048 }
  0x24   :  { %s50_s28 = sshll.u32 %s707_s26, 4  ;;  %p654_p2 = scmp.ne.s32.totalorder %s863_s5, %s653_s8  ;;  %s51_s28 = int_to_ptr.vmem [resolvable:$true] %s50_s28 }
  0x25   :  { %p657_p3 = scmp.lt.u32.totalorder %s653_s8, %s863_s5 }
  0x27   :  { %p659_p4 = pnand %p657_p3, %p654_p2 }
  0x29   :  { %662 = shalt.err (!%p659_p4)
}
  0x2a   :  { %s663_s15 = scalar_lea.vmem %s51_s28, 2048  ;;  %p668_p6 = scmp.lt.s32.totalorder %s51_s28, %s51_s28 }
  0x2b   :  { %p664_p5 = scmp.ne.s32.totalorder %s51_s28, %s663_s15  ;;  %p669_p7 = scmp.lt.s32.totalorder %s663_s15, %s663_s15 }
  0x2d   :  { %p670_p8 = por %p669_p7, %p668_p6 }
  0x2f   :  { %p671_p9 = pnand %p670_p8, %p664_p5 }
  0x31   :  { %674 = shalt.err (!%p671_p9)
}
  0x32   :  { %56 = dma.hbm_to_vmem [thread:$0]  %s863_s5, 2048, %s51_s28, [#allocation6], %s705_s13, %s705_s13, %s706_s14  }
  0x33   :  { %697 = dma.done.wait [#allocation3], 2048  }
  0x34   :  { %698 = vsyncadd [#allocation3], 4294965248 }
  0x35   :  { %699 = dma.done.wait [#allocation6], 4096  }
  0x36   :  { %700 = vsyncadd [#allocation6], 4294963200  ;;  %v708_v0 = vmov 0.0|0.0   ;;  %vm709_vm0 = vmmov 0   ;;  %v710_v1 = vmov 0.0   ;;  %v69_v2 = vld [vmem:[#allocation2] sm:$0xff] }
  0x37   :  { %528 = vmatprep.subr.bf16.mxu0 %v708_v0  ;;  %455 = vmatprep.mubr.msk.f32.mxu0 %vm709_vm0, %v710_v1  ;;  %v70_v3 = vld [vmem:[#allocation2 + $0x8] sm:$0xff]  ;;  %v71_v4 = vld [vmem:[#allocation2 + $0x10] sm:$0xff]  ;;  %v72_v6 = vld [vmem:[#allocation2 + $0x18] sm:$0xff]  ;;  %s711_s19 = smov [#allocation8]  }
  0x38   :  { %552 = vmatprep.subr.bf16.mxu1 %v708_v0  ;;  %490 = vmatprep.mubr.msk.f32.mxu1 %vm709_vm0, %v710_v1  ;;  %v529_v5 = vpack.c.bf16 %v70_v3, %v69_v2  ;;  %v532_v7 = vpack.c.bf16 %v72_v6, %v71_v4  ;;  %v73_v8 = vld [vmem:[#allocation2 + $0x20] sm:$0xff]  ;;  %v74_v9 = vld [vmem:[#allocation2 + $0x28] sm:$0xff]  ;;  %v165_v12 = vld [vmem:[#allocation5 + $0x10] sm:$0xff]  ;;  %s359_s20 = sshll.u32 %s711_s19, 4  ;;  %s360_s20 = int_to_ptr.vmem [resolvable:$true] %s359_s20 }
  0x39   :  { %v163_v10 = vld [vmem:[#allocation5] sm:$0xff]  ;;  %v164_v11 = vld [vmem:[#allocation5 + $0x8] sm:$0xff]  ;;  %v166_v13 = vld [vmem:[#allocation5 + $0x18] sm:$0xff]  ;;  %v535_v14 = vpack.c.bf16 %v74_v9, %v73_v8  ;;  %s675_s21 = scalar_lea.vmem %s360_s20, 128  ;;  %p680_p11 = scmp.lt.s32.totalorder %s360_s20, %s360_s20 }
  0x3a   :  { %530 = vmatpush3.bf16.msra.mxu0 %v529_v5  ;;  %v553_v15 = vpack.c.bf16 %v164_v11, %v163_v10  ;;  %v75_v16 = vld [vmem:[#allocation2 + $0x30] sm:$0xff]  ;;  %v76_v17 = vld [vmem:[#allocation2 + $0x38] sm:$0xff]  ;;  %v556_v18 = vpack.c.bf16 %v166_v13, %v165_v12  ;;  %v167_v19 = vld [vmem:[#allocation5 + $0x20] sm:$0xff]  ;;  %p676_p10 = scmp.ne.s32.totalorder %s360_s20, %s675_s21  ;;  %p681_p12 = scmp.lt.s32.totalorder %s675_s21, %s675_s21 }
  0x3b   :  { %531 = vmatprep.subr.bf16.mxu0 %v708_v0  ;;  %v168_v20 = vld [vmem:[#allocation5 + $0x28] sm:$0xff]  ;;  %v538_v21 = vpack.c.bf16 %v76_v17, %v75_v16  ;;  %v77_v22 = vld [vmem:[#allocation2 + $0x40] sm:$0xff]  ;;  %v169_v25 = vld [vmem:[#allocation5 + $0x30] sm:$0xff] }
  0x3c   :  { %554 = vmatpush3.bf16.msra.mxu1 %v553_v15  ;;  %v78_v23 = vld [vmem:[#allocation2 + $0x48] sm:$0xff]  ;;  %v559_v24 = vpack.c.bf16 %v168_v20, %v167_v19  ;;  %v170_v26 = vld [vmem:[#allocation5 + $0x38] sm:$0xff]  ;;  %v79_v28 = vld [vmem:[#allocation2 + $0x50] sm:$0xff]  ;;  %p682_p13 = por %p681_p12, %p680_p11 }
  0x3d   :  { %555 = vmatprep.subr.bf16.mxu1 %v708_v0  ;;  %v541_v27 = vpack.c.bf16 %v78_v23, %v77_v22  ;;  %v80_v29 = vld [vmem:[#allocation2 + $0x58] sm:$0xff]  ;;  %v562_v30 = vpack.c.bf16 %v170_v26, %v169_v25  ;;  %v171_v31 = vld [vmem:[#allocation5 + $0x40] sm:$0xff]  ;;  %v172_v32 = vld [vmem:[#allocation5 + $0x48] sm:$0xff] }
  0x3e   :  { %533 = vmatpush3.bf16.msra.mxu0 %v532_v7  ;;  %v544_v33 = vpack.c.bf16 %v80_v29, %v79_v28  ;;  %v81_v34 = vld [vmem:[#allocation2 + $0x60] sm:$0xff]  ;;  %v82_v35 = vld [vmem:[#allocation2 + $0x68] sm:$0xff]  ;;  %v565_v36 = vpack.c.bf16 %v172_v32, %v171_v31  ;;  %v173_v37 = vld [vmem:[#allocation5 + $0x50] sm:$0xff]  ;;  %p683_p0 = pnand %p682_p13, %p676_p10 }
  0x3f   :  { %534 = vmatprep.subr.bf16.mxu0 %v708_v0  ;;  %v174_v38 = vld [vmem:[#allocation5 + $0x58] sm:$0xff]  ;;  %v547_v39 = vpack.c.bf16 %v82_v35, %v81_v34  ;;  %v83_v40 = vld [vmem:[#allocation2 + $0x70] sm:$0xff]  ;;  %v175_v43 = vld [vmem:[#allocation5 + $0x60] sm:$0xff] }
  0x40   :  { %557 = vmatpush3.bf16.msra.mxu1 %v556_v18  ;;  %v84_v41 = vld [vmem:[#allocation2 + $0x78] sm:$0xff]  ;;  %v568_v42 = vpack.c.bf16 %v174_v38, %v173_v37  ;;  %v176_v44 = vld [vmem:[#allocation5 + $0x68] sm:$0xff]  ;;  %v68_v47 = vld [vmem:[%s858_s0] sm:$0xff] }
  0x41   :  { %558 = vmatprep.subr.bf16.mxu1 %v708_v0  ;;  %v550_v45 = vpack.c.bf16 %v84_v41, %v83_v40  ;;  %v571_v46 = vpack.c.bf16 %v176_v44, %v175_v43  ;;  %v177_v48 = vld [vmem:[#allocation5 + $0x70] sm:$0xff]  ;;  %v178_v49 = vld [vmem:[#allocation5 + $0x78] sm:$0xff]  ;;  %v259_v51 = vld [vmem:[#allocation7] sm:$0xff] }
  0x42   :  { %536 = vmatpush3.bf16.msra.mxu0 %v535_v14  ;;  %v574_v50 = vpack.c.bf16 %v178_v49, %v177_v48  ;;  %v260_v52 = vld [vmem:[#allocation7 + $0x8] sm:$0xff]  ;;  %v261_v53 = vld [vmem:[#allocation7 + $0x10] sm:$0xff]  ;;  %v262_v55 = vld [vmem:[#allocation7 + $0x18] sm:$0xff] }
  0x43   :  { %537 = vmatprep.subr.bf16.mxu0 %v708_v0  ;;  %v577_v54 = vpack.c.bf16 %v260_v52, %v259_v51  ;;  %v580_v56 = vpack.c.bf16 %v262_v55, %v261_v53  ;;  %v263_v57 = vld [vmem:[#allocation7 + $0x20] sm:$0xff]  ;;  %v264_v58 = vld [vmem:[#allocation7 + $0x28] sm:$0xff]  ;;  %v265_v60 = vld [vmem:[#allocation7 + $0x30] sm:$0xff] }
  0x44   :  { %560 = vmatpush3.bf16.msra.mxu1 %v559_v24  ;;  %v583_v59 = vpack.c.bf16 %v264_v58, %v263_v57  ;;  %v266_v61 = vld [vmem:[#allocation7 + $0x38] sm:$0xff]  ;;  %v267_v63 = vld [vmem:[#allocation7 + $0x40] sm:$0xff]  ;;  %v269_v3 = vld [vmem:[#allocation7 + $0x50] sm:$0xff] }
  0x45   :  { %561 = vmatprep.subr.bf16.mxu1 %v708_v0  ;;  %v586_v62 = vpack.c.bf16 %v266_v61, %v265_v60  ;;  %v270_v4 = vld [vmem:[#allocation7 + $0x58] sm:$0xff]  ;;  %v271_v6 = vld [vmem:[#allocation7 + $0x60] sm:$0xff]  ;;  %v272_v7 = vld [vmem:[#allocation7 + $0x68] sm:$0xff] }
  0x46   :  { %539 = vmatpush3.bf16.msra.mxu0 %v538_v21  ;;  %v592_v5 = vpack.c.bf16 %v270_v4, %v269_v3  ;;  %v595_v8 = vpack.c.bf16 %v272_v7, %v271_v6  ;;  %v369_v9 = vld [vmem:[%s860_s2] ss:$0 sm:$0xff]  ;;  %v273_v14 = vld [vmem:[#allocation7 + $0x70] sm:$0xff]  ;;  %v274_v15 = vld [vmem:[#allocation7 + $0x78] sm:$0xff] }
  0x47   :  { %540 = vmatprep.subr.bf16.mxu0 %v708_v0  ;;  %v598_v16 = vpack.c.bf16 %v274_v15, %v273_v14  ;;  %v370_v17 = vld [vmem:[%s862_s4] ss:$0 sm:$0xff] }
  0x48   :  { %563 = vmatpush3.bf16.msra.mxu1 %v562_v30  ;;  %v371_v22 = vld [vmem:[%s864_s6] ss:$0 sm:$0xff] }
  0x49   :  { %564 = vmatprep.subr.bf16.mxu1 %v708_v0 }
  0x4a   :  { %542 = vmatpush3.bf16.msra.mxu0 %v541_v27 }
  0x4b   :  { %543 = vmatprep.subr.bf16.mxu0 %v708_v0 }
  0x4c   :  { %566 = vmatpush3.bf16.msra.mxu1 %v565_v36 }
  0x4d   :  { %567 = vmatprep.subr.bf16.mxu1 %v708_v0 }
  0x4e   :  { %545 = vmatpush3.bf16.msra.mxu0 %v544_v33 }
  0x4f   :  { %546 = vmatprep.subr.bf16.mxu0 %v708_v0 }
  0x50   :  { %569 = vmatpush3.bf16.msra.mxu1 %v568_v42 }
  0x51   :  { %570 = vmatprep.subr.bf16.mxu1 %v708_v0 }
  0x52   :  { %548 = vmatpush3.bf16.msra.mxu0 %v547_v39 }
  0x53   :  { %549 = vmatprep.subr.bf16.mxu0 %v708_v0 }
  0x54   :  { %572 = vmatpush3.bf16.msra.mxu1 %v571_v46 }
  0x55   :  { %573 = vmatprep.subr.bf16.mxu1 %v708_v0 }
  0x56   :  { %551 = vmatpush3.bf16.msra.mxu0 %v550_v45 }
  0x57   :  { %576 = vmatprep.subr.bf16.mxu0 %v708_v0 }
  0x58   :  { %575 = vmatpush3.bf16.msra.mxu1 %v574_v50 }
  0x59   :  { %456 = vmatmul.mubr.f32.vlgmr.msra.gmra.mrb[0].mxu0 %v68_v47 }
  0x5a   :  { %525 = vmatprep.mubr.msk.f32.mxu0 %vm709_vm0, %v710_v1  ;;  %578 = vmatpush3.bf16.msra.mxu0 %v577_v54  ;;  %v268_v1 = vld [vmem:[#allocation7 + $0x48] sm:$0xff] }
  0x5b   :  { %579 = vmatprep.subr.bf16.mxu0 %v708_v0  ;;  %v589_v2 = vpack.c.bf16 %v268_v1, %v267_v63 }
  0x5e   :  { %581 = vmatpush3.bf16.msra.mxu0 %v580_v56 }
  0x5f   :  { %582 = vmatprep.subr.bf16.mxu0 %v708_v0 }
  0x62   :  { %584 = vmatpush3.bf16.msra.mxu0 %v583_v59 }
  0x63   :  { %585 = vmatprep.subr.bf16.mxu0 %v708_v0 }
  0x66   :  { %587 = vmatpush3.bf16.msra.mxu0 %v586_v62 }
  0x67   :  { %588 = vmatprep.subr.bf16.mxu0 %v708_v0 }
  0x6a   :  { %590 = vmatpush3.bf16.msra.mxu0 %v589_v2 }
  0x6b   :  { %591 = vmatprep.subr.bf16.mxu0 %v708_v0 }
  0x6e   :  { %593 = vmatpush3.bf16.msra.mxu0 %v592_v5 }
  0x6f   :  { %594 = vmatprep.subr.bf16.mxu0 %v708_v0 }
  0x72   :  { %596 = vmatpush3.bf16.msra.mxu0 %v595_v8 }
  0x73   :  { %597 = vmatprep.subr.bf16.mxu0 %v708_v0 }
  0x76   :  { %599 = vmatpush3.bf16.msra.mxu0 %v598_v16 }
 0x12c   :  { %v158_v10 = vpop.f32.mrb[0].mxu0 }
 0x12d   :  { %v159_v11 = vadd.f32 %v369_v9, %v158_v10  ;;  %v457_v12 = vpop.f32.mrb[1].mxu0 }
 0x12f   :  { %v162_v13 = vmax.f32 %v159_v11, 0.0 }
 0x131   :  { %491 = vmatmul.mubr.f32.vlgmr.msra.gmra.mrb[0].mxu1 %v162_v13 }
 0x204   :  { %v252_v18 = vpop.f32.mrb[0].mxu1 }
 0x205   :  { %v253_v19 = vadd.f32 %v370_v17, %v252_v18  ;;  %v492_v0 = vpop.f32.mrb[1].mxu1 }
 0x207   :  { %vm256_vm1 = vcmp.ge.f32.partialorder %v253_v19, 0.0  ;;  %v257_v20 = vmul.f32 0.1, %v253_v19 }
 0x209   :  { %v258_v21 = vsel %vm256_vm1, %v253_v19, %v257_v20 }
 0x20a   :  { %526 = vmatmul.mubr.f32.vlgmr.msra.gmra.mrb[2].mxu0 %v258_v21 }
 0x2dd   :  { %v348_v23 = vpop.f32.mrb[2].mxu0 }
 0x2de   :  { %v349_v24 = vadd.f32 %v371_v22, %v348_v23  ;;  %v527_v25 = vpop.f32.mrb[3].mxu0 }
 0x2e0   :  { %352 = vst [vmem:[#allocation8] sm:$0xff] %v349_v24 }
 0x2e1   :  { %686 = shalt.err (!%p683_p0)
}
 0x2e2   :  { %s687_s23 = scalar_lea.hbm %s865_s7, 128 }
 0x2e3   :  { %p688_p1 = scmp.ne.s32.totalorder %s865_s7, %s687_s23  ;;  %p691_p2 = scmp.lt.u32.totalorder %s687_s23, %s865_s7 }
 0x2e5   :  { %p693_p3 = pnand %p691_p2, %p688_p1 }
 0x2e7   :  { %696 = shalt.err (!%p693_p3)
}
 0x2e8   :  { %362 = dma.vmem_to_hbm [thread:$0]  %s360_s20, 128, %s865_s7, [#allocation4]  }
 0x2e9   :  { %701 = dma.done.wait [#allocation4], 128  }
 0x2ea   :  { %702 = vsyncadd [#allocation4], 4294967168 }
 0x2eb   :  { %366 = vsyncpa [#allocation3], 1 }
 0x2ec   :  { %367 = vsyncpa [#allocation6], 1 }
 0x2ed   :  { %368 = vsyncpa [#allocation4], 1 }

</bundles_post_ra>
